<compile_context>
chip_gen: v7x
topology: tpu7x:2x2x1
jax: 0.10.0
libtpu: 0.0.40
codegen_flags: <defaults>
</compile_context>

<pallas_src>
import functools

import jax
import jax.numpy as jnp
from jax import lax
from jax.experimental import pallas as pl
from jax.experimental.pallas import tpu as pltpu

EPS = 1e-5
K = 3  # depthwise kernel size (stride 1, padding K // 2)


def _vmem_limit_bytes():
    # Derive the scoped-VMEM cap from the chip instead of hard-coding 32 MiB
    # (128 MiB on v5e/v6e, 64 MiB on v7x), leaving headroom for the compiler.
    try:
        cap = pltpu.get_tpu_info().vmem_capacity_bytes
    except Exception:
        cap = 64 * 1024 * 1024
    return int(max(32 * 1024 * 1024, min(int(cap * 0.75), 112 * 1024 * 1024)))


_VMEM_LIMIT = _vmem_limit_bytes()


# --------------------------------------------------------------------------
# Kernel 1: depthwise 3x3 (SAME) + per-image BN1 partial statistics.
# --------------------------------------------------------------------------
def _dw_kernel(x_ref, wmask_ref, y_ref, s_ref, q_ref, *, W):
    # x_ref     : (1, Cin, HW)
    # wmask_ref : (K*K, Cin, HW)   tap weights with boundary masks pre-folded
    # y_ref     : (1, Cin, HW)     raw depthwise output
    # s_ref     : (1, Cin, 1)      sum over HW
    # q_ref     : (1, Cin, 1)      sum of squares over HW
    x = x_ref[0].astype(jnp.float32)                 # (Cin, HW)
    hw = x.shape[1]

    acc = x * wmask_ref[(K * K) // 2]                # center tap (mask == 1)
    for kh in range(K):
        for kw in range(K):
            dh, dw = kh - K // 2, kw - K // 2
            d = dh * W + dw                          # flat-index offset of tap
            if d == 0:
                continue
            shifted = pltpu.roll(x, (-d) % hw, axis=1)       # [p] <- x[p + d]
            acc = acc + shifted * wmask_ref[kh * K + kw]     # mask pre-folded

    y_ref[0] = acc.astype(y_ref.dtype)
    s_ref[0] = jnp.sum(acc, axis=1, keepdims=True)
    q_ref[0] = jnp.sum(acc * acc, axis=1, keepdims=True)


# --------------------------------------------------------------------------
# Kernel 2: folded BN1 + Swish + pointwise 1x1 (MXU) + BN2 partial statistics.
# --------------------------------------------------------------------------
def _pw_kernel(y_ref, sc_ref, sh_ref, w_ref, y2_ref, s_ref, q_ref, *, use_bf16):
    # y_ref : (1, Cin, HW)   sc/sh : (Cin, 1)   w_ref : (Cout, Cin)
    y = y_ref[0] * sc_ref[...] + sh_ref[...]         # folded BN1 affine
    y = y * jax.nn.sigmoid(y)                        # Swish
    w = w_ref[...]
    if use_bf16:
        t = jnp.dot(w.astype(jnp.bfloat16), y.astype(jnp.bfloat16),
                    preferred_element_type=jnp.float32)       # (Cout, HW)
    else:
        t = jnp.dot(w, y, preferred_element_type=jnp.float32)
    y2_ref[0] = t.astype(y2_ref.dtype)
    s_ref[0] = jnp.sum(t, axis=1, keepdims=True)
    q_ref[0] = jnp.sum(t * t, axis=1, keepdims=True)


# --------------------------------------------------------------------------
# Kernel 3: folded BN2 + Swish (lane-dense stores).
# --------------------------------------------------------------------------
def _bn_act_kernel(y2_ref, sc_ref, sh_ref, o_ref):
    t = y2_ref[0] * sc_ref[...] + sh_ref[...]        # folded BN2 affine
    o_ref[0] = (t * jax.nn.sigmoid(t)).astype(o_ref.dtype)


@functools.partial(jax.jit, static_argnames=("use_bf16",))
def depthwise_conv_forward(x_nchw, w_dw, g1, b1, w_pw, g2, b2, use_bf16=True):
    """DepthwiseConv forward.

    x_nchw : (N, Cin, H, W)
    w_dw   : (Cin, K, K)     (torch depthwise weight (Cin,1,K,K) squeezed)
    w_pw   : (Cout, Cin)     (torch pointwise weight (Cout,Cin,1,1) squeezed)
    g1,b1  : (Cin,)   g2,b2 : (Cout,)
    returns (N, Cout, H, W)
    """
    N, Cin, H, W = x_nchw.shape
    Cout = w_pw.shape[0]
    HW = H * W
    cnt = jnp.float32(N * HW)

    x3 = x_nchw.reshape(N, Cin, HW)                  # metadata-only reshape

    # Pre-fold the SAME-padding validity masks into the depthwise tap weights
    # (tiny O(K*K*Cin*HW) one-off work, constant & VMEM-resident in the kernel).
    pos = jnp.arange(HW, dtype=jnp.int32)
    hh, ww = pos // W, pos % W
    masks = []
    for kh in range(K):
        for kw in range(K):
            dh, dw = kh - K // 2, kw - K // 2
            valid = ((hh + dh >= 0) & (hh + dh < H) &
                     (ww + dw >= 0) & (ww + dw < W))
            masks.append(valid.astype(jnp.float32))
    mask = jnp.stack(masks)                                           # (K*K, HW)
    wtaps = jnp.transpose(w_dw.reshape(Cin, K * K), (1, 0))           # (K*K, Cin)
    wmask = wtaps[:, :, None].astype(jnp.float32) * mask[:, None, :]  # (K*K,Cin,HW)

    cparams = pltpu.CompilerParams(dimension_semantics=("parallel",),
                                   vmem_limit_bytes=_VMEM_LIMIT)

    # ---- pass 1: depthwise conv + BN1 partial stats -------------------------
    cost1 = pl.CostEstimate(
        flops=2 * K * K * N * Cin * HW + 4 * N * Cin * HW,
        transcendentals=0,
        bytes_accessed=4 * (2 * N * Cin * HW + K * K * Cin * HW + 2 * N * Cin))
    y, s1, q1 = pl.pallas_call(
        functools.partial(_dw_kernel, W=W),
        out_shape=(jax.ShapeDtypeStruct((N, Cin, HW), jnp.float32),
                   jax.ShapeDtypeStruct((N, Cin, 1), jnp.float32),
                   jax.ShapeDtypeStruct((N, Cin, 1), jnp.float32)),
        grid_spec=pltpu.PrefetchScalarGridSpec(
            num_scalar_prefetch=0,
            grid=(N,),
            in_specs=[pl.BlockSpec((1, Cin, HW), lambda n: (n, 0, 0)),
                      pl.BlockSpec((K * K, Cin, HW), lambda n: (0, 0, 0))],
            out_specs=(pl.BlockSpec((1, Cin, HW), lambda n: (n, 0, 0)),
                       pl.BlockSpec((1, Cin, 1), lambda n: (n, 0, 0)),
                       pl.BlockSpec((1, Cin, 1), lambda n: (n, 0, 0)))),
        compiler_params=cparams,
        cost_estimate=cost1,
    )(x3, wmask)

    # Combine BN1 stats globally over (N, H, W); fold into one scale/shift.
    mean1 = jnp.sum(s1, axis=0) / cnt                       # (Cin, 1)
    var1 = jnp.sum(q1, axis=0) / cnt - mean1 * mean1        # biased variance
    scale1 = lax.rsqrt(var1 + EPS) * g1.reshape(Cin, 1)
    shift1 = b1.reshape(Cin, 1) - mean1 * scale1

    # ---- pass 2: BN1 affine + Swish + pointwise matmul + BN2 partial stats --
    cost2 = pl.CostEstimate(
        flops=2 * N * Cin * Cout * HW + 6 * N * Cin * HW + 4 * N * Cout * HW,
        transcendentals=N * Cin * HW,
        bytes_accessed=4 * (N * Cin * HW + N * Cout * HW + Cout * Cin
                            + 2 * Cin + 2 * N * Cout))
    y2, s2, q2 = pl.pallas_call(
        functools.partial(_pw_kernel, use_bf16=use_bf16),
        out_shape=(jax.ShapeDtypeStruct((N, Cout, HW), jnp.float32),
                   jax.ShapeDtypeStruct((N, Cout, 1), jnp.float32),
                   jax.ShapeDtypeStruct((N, Cout, 1), jnp.float32)),
        grid_spec=pltpu.PrefetchScalarGridSpec(
            num_scalar_prefetch=0,
            grid=(N,),
            in_specs=[pl.BlockSpec((1, Cin, HW), lambda n: (n, 0, 0)),
                      pl.BlockSpec((Cin, 1), lambda n: (0, 0)),
                      pl.BlockSpec((Cin, 1), lambda n: (0, 0)),
                      pl.BlockSpec((Cout, Cin), lambda n: (0, 0))],
            out_specs=(pl.BlockSpec((1, Cout, HW), lambda n: (n, 0, 0)),
                       pl.BlockSpec((1, Cout, 1), lambda n: (n, 0, 0)),
                       pl.BlockSpec((1, Cout, 1), lambda n: (n, 0, 0)))),
        compiler_params=cparams,
        cost_estimate=cost2,
    )(y, scale1, shift1, w_pw.astype(jnp.float32))

    # Combine BN2 stats globally; fold into one scale/shift.
    mean2 = jnp.sum(s2, axis=0) / cnt                       # (Cout, 1)
    var2 = jnp.sum(q2, axis=0) / cnt - mean2 * mean2
    scale2 = lax.rsqrt(var2 + EPS) * g2.reshape(Cout, 1)
    shift2 = b2.reshape(Cout, 1) - mean2 * scale2

    # ---- pass 3: BN2 affine + Swish ------------------------------------------
    cost3 = pl.CostEstimate(
        flops=5 * N * Cout * HW,
        transcendentals=N * Cout * HW,
        bytes_accessed=4 * (2 * N * Cout * HW + 2 * Cout))
    out3 = pl.pallas_call(
        _bn_act_kernel,
        out_shape=jax.ShapeDtypeStruct((N, Cout, HW), x_nchw.dtype),
        grid_spec=pltpu.PrefetchScalarGridSpec(
            num_scalar_prefetch=0,
            grid=(N,),
            in_specs=[pl.BlockSpec((1, Cout, HW), lambda n: (n, 0, 0)),
                      pl.BlockSpec((Cout, 1), lambda n: (0, 0)),
                      pl.BlockSpec((Cout, 1), lambda n: (0, 0))],
            out_specs=pl.BlockSpec((1, Cout, HW), lambda n: (n, 0, 0))),
        compiler_params=cparams,
        cost_estimate=cost3,
    )(y2, scale2, shift2)

    return out3.reshape(N, Cout, H, W)


def _reference_forward(x, w_dw, g1, b1, w_pw, g2, b2):
    """Pure-JAX reference (same math as torch module, f32) for correctness."""
    N, Cin, H, W = x.shape
    pad = K // 2
    xf = x.astype(jnp.float32)
    xp = jnp.pad(xf, ((0, 0), (0, 0), (pad, pad), (pad, pad)))
    y = jnp.zeros((N, Cin, H, W), jnp.float32)
    for kh in range(K):
        for kw in range(K):
            y = y + xp[:, :, kh:kh + H, kw:kw + W] * w_dw[:, kh, kw][None, :, None, None]
    m1 = y.mean(axis=(0, 2, 3), keepdims=True)
    v1 = ((y - m1) ** 2).mean(axis=(0, 2, 3), keepdims=True)
    y = (y - m1) / jnp.sqrt(v1 + EPS) * g1[None, :, None, None] + b1[None, :, None, None]
    y = y * jax.nn.sigmoid(y)
    y2 = jnp.einsum("oc,nchw->nohw", w_pw.astype(jnp.float32), y)
    m2 = y2.mean(axis=(0, 2, 3), keepdims=True)
    v2 = ((y2 - m2) ** 2).mean(axis=(0, 2, 3), keepdims=True)
    y2 = (y2 - m2) / jnp.sqrt(v2 + EPS) * g2[None, :, None, None] + b2[None, :, None, None]
    return y2 * jax.nn.sigmoid(y2)


if __name__ == "__main__":
    # Small module config (consistent with the torch module's __init__).
    N, Cin, Cout, H, W = 2, 8, 16, 16, 16

    key = jax.random.PRNGKey(0)
    kx, kdw, kpw = jax.random.split(key, 3)

    # Deterministic parameter init (torch-default-style bounds and shapes):
    #   depthwise Conv2d weight (Cin,1,K,K) -> (Cin,K,K)
    #   pointwise Conv2d weight (Cout,Cin,1,1) -> (Cout,Cin)
    #   BatchNorm2d: gamma = 1, beta = 0 (torch default affine init)
    bound_dw = 1.0 / (K * K) ** 0.5
    bound_pw = 1.0 / Cin ** 0.5
    w_dw = jax.random.uniform(kdw, (Cin, K, K), jnp.float32, -bound_dw, bound_dw)
    w_pw = jax.random.uniform(kpw, (Cout, Cin), jnp.float32, -bound_pw, bound_pw)
    g1 = jnp.ones((Cin,), jnp.float32)
    b1 = jnp.zeros((Cin,), jnp.float32)
    g2 = jnp.ones((Cout,), jnp.float32)
    b2 = jnp.zeros((Cout,), jnp.float32)

    x = jax.random.normal(kx, (N, Cin, H, W), jnp.float32)

    ref = _reference_forward(x, w_dw, g1, b1, w_pw, g2, b2)

    # Default (perf) path: bf16 MXU inputs, f32 accumulation / BN statistics.
    out = depthwise_conv_forward(x, w_dw, g1, b1, w_pw, g2, b2)
    out = jax.block_until_ready(out)
    assert out.shape == (N, Cout, H, W) and out.dtype == jnp.float32
    assert jnp.allclose(out, ref, atol=6e-2, rtol=6e-2), "mismatch (bf16 MXU path)"

    # Strict f32 path for a tight numerical check of the same kernel structure.
    out_f32 = depthwise_conv_forward(x, w_dw, g1, b1, w_pw, g2, b2, use_bf16=False)
    out_f32 = jax.block_until_ready(out_f32)
    assert jnp.allclose(out_f32, ref, atol=1e-3, rtol=1e-3), "mismatch (f32 path)"

    print("KERNEL_OK")
</pallas_src>

<mosaic_0001>
module attributes {stable_mosaic.version = 11 : i64} {
  func.func @_dw_kernel(%arg0: i32, %arg1: memref<1x8x256xf32, #tpu.memory_space<vmem>>, %arg2: memref<9x8x256xf32, #tpu.memory_space<vmem>>, %arg3: memref<1x8x256xf32, #tpu.memory_space<vmem>>, %arg4: memref<1x8x1xf32, #tpu.memory_space<vmem>>, %arg5: memref<1x8x1xf32, #tpu.memory_space<vmem>>) attributes {dimension_semantics = [#tpu.dimension_semantics<parallel>], iteration_bounds = array<i64: 2>, scalar_prefetch = 0 : i64, scratch_operands = 0 : i64, tpu.core_type = #tpu.core_type<tc>, window_params = [{transform_indices = @transform_0, window_bounds = array<i64: 1, 8, 256>}, {pipeline_mode = #tpu.pipeline_mode<synchronous>, transform_indices = @transform_1, window_bounds = array<i64: 9, 8, 256>}, {transform_indices = @transform_2, window_bounds = array<i64: 1, 8, 256>}, {transform_indices = @transform_3, window_bounds = array<i64: 1, 8, 1>}, {transform_indices = @transform_4, window_bounds = array<i64: 1, 8, 1>}]} {
    %c0 = arith.constant 0 : index
    %c0_0 = arith.constant 0 : index
    %c0_1 = arith.constant 0 : index
    %0 = vector.load %arg1[%c0, %c0_0, %c0_1] : memref<1x8x256xf32, #tpu.memory_space<vmem>>, vector<1x8x256xf32>
    %1 = vector.shape_cast %0 : vector<1x8x256xf32> to vector<8x256xf32>
    %c4 = arith.constant 4 : index
    %c0_2 = arith.constant 0 : index
    %c0_3 = arith.constant 0 : index
    %2 = vector.load %arg2[%c4, %c0_2, %c0_3] : memref<9x8x256xf32, #tpu.memory_space<vmem>>, vector<1x8x256xf32>
    %3 = vector.shape_cast %2 : vector<1x8x256xf32> to vector<8x256xf32>
    %4 = arith.mulf %1, %3 : vector<8x256xf32>
    %c17_i32 = arith.constant 17 : i32
    %5 = tpu.dynamic_rotate %1 by %c17_i32 dim 1 : vector<8x256xf32>, i32 -> vector<8x256xf32>
    %c0_4 = arith.constant 0 : index
    %c0_5 = arith.constant 0 : index
    %c0_6 = arith.constant 0 : index
    %6 = vector.load %arg2[%c0_4, %c0_5, %c0_6] : memref<9x8x256xf32, #tpu.memory_space<vmem>>, vector<1x8x256xf32>
    %7 = vector.shape_cast %6 : vector<1x8x256xf32> to vector<8x256xf32>
    %8 = arith.mulf %5, %7 : vector<8x256xf32>
    %9 = arith.addf %4, %8 : vector<8x256xf32>
    %c16_i32 = arith.constant 16 : i32
    %10 = tpu.dynamic_rotate %1 by %c16_i32 dim 1 : vector<8x256xf32>, i32 -> vector<8x256xf32>
    %c1 = arith.constant 1 : index
    %c0_7 = arith.constant 0 : index
    %c0_8 = arith.constant 0 : index
    %11 = vector.load %arg2[%c1, %c0_7, %c0_8] : memref<9x8x256xf32, #tpu.memory_space<vmem>>, vector<1x8x256xf32>
    %12 = vector.shape_cast %11 : vector<1x8x256xf32> to vector<8x256xf32>
    %13 = arith.mulf %10, %12 : vector<8x256xf32>
    %14 = arith.addf %9, %13 : vector<8x256xf32>
    %c15_i32 = arith.constant 15 : i32
    %15 = tpu.dynamic_rotate %1 by %c15_i32 dim 1 : vector<8x256xf32>, i32 -> vector<8x256xf32>
    %c2 = arith.constant 2 : index
    %c0_9 = arith.constant 0 : index
    %c0_10 = arith.constant 0 : index
    %16 = vector.load %arg2[%c2, %c0_9, %c0_10] : memref<9x8x256xf32, #tpu.memory_space<vmem>>, vector<1x8x256xf32>
    %17 = vector.shape_cast %16 : vector<1x8x256xf32> to vector<8x256xf32>
    %18 = arith.mulf %15, %17 : vector<8x256xf32>
    %19 = arith.addf %14, %18 : vector<8x256xf32>
    %c1_i32 = arith.constant 1 : i32
    %20 = tpu.dynamic_rotate %1 by %c1_i32 dim 1 : vector<8x256xf32>, i32 -> vector<8x256xf32>
    %c3 = arith.constant 3 : index
    %c0_11 = arith.constant 0 : index
    %c0_12 = arith.constant 0 : index
    %21 = vector.load %arg2[%c3, %c0_11, %c0_12] : memref<9x8x256xf32, #tpu.memory_space<vmem>>, vector<1x8x256xf32>
    %22 = vector.shape_cast %21 : vector<1x8x256xf32> to vector<8x256xf32>
    %23 = arith.mulf %20, %22 : vector<8x256xf32>
    %24 = arith.addf %19, %23 : vector<8x256xf32>
    %c255_i32 = arith.constant 255 : i32
    %25 = tpu.dynamic_rotate %1 by %c255_i32 dim 1 : vector<8x256xf32>, i32 -> vector<8x256xf32>
    %c5 = arith.constant 5 : index
    %c0_13 = arith.constant 0 : index
    %c0_14 = arith.constant 0 : index
    %26 = vector.load %arg2[%c5, %c0_13, %c0_14] : memref<9x8x256xf32, #tpu.memory_space<vmem>>, vector<1x8x256xf32>
    %27 = vector.shape_cast %26 : vector<1x8x256xf32> to vector<8x256xf32>
    %28 = arith.mulf %25, %27 : vector<8x256xf32>
    %29 = arith.addf %24, %28 : vector<8x256xf32>
    %c241_i32 = arith.constant 241 : i32
    %30 = tpu.dynamic_rotate %1 by %c241_i32 dim 1 : vector<8x256xf32>, i32 -> vector<8x256xf32>
    %c6 = arith.constant 6 : index
    %c0_15 = arith.constant 0 : index
    %c0_16 = arith.constant 0 : index
    %31 = vector.load %arg2[%c6, %c0_15, %c0_16] : memref<9x8x256xf32, #tpu.memory_space<vmem>>, vector<1x8x256xf32>
    %32 = vector.shape_cast %31 : vector<1x8x256xf32> to vector<8x256xf32>
    %33 = arith.mulf %30, %32 : vector<8x256xf32>
    %34 = arith.addf %29, %33 : vector<8x256xf32>
    %c240_i32 = arith.constant 240 : i32
    %35 = tpu.dynamic_rotate %1 by %c240_i32 dim 1 : vector<8x256xf32>, i32 -> vector<8x256xf32>
    %c7 = arith.constant 7 : index
    %c0_17 = arith.constant 0 : index
    %c0_18 = arith.constant 0 : index
    %36 = vector.load %arg2[%c7, %c0_17, %c0_18] : memref<9x8x256xf32, #tpu.memory_space<vmem>>, vector<1x8x256xf32>
    %37 = vector.shape_cast %36 : vector<1x8x256xf32> to vector<8x256xf32>
    %38 = arith.mulf %35, %37 : vector<8x256xf32>
    %39 = arith.addf %34, %38 : vector<8x256xf32>
    %c239_i32 = arith.constant 239 : i32
    %40 = tpu.dynamic_rotate %1 by %c239_i32 dim 1 : vector<8x256xf32>, i32 -> vector<8x256xf32>
    %c8 = arith.constant 8 : index
    %c0_19 = arith.constant 0 : index
    %c0_20 = arith.constant 0 : index
    %41 = vector.load %arg2[%c8, %c0_19, %c0_20] : memref<9x8x256xf32, #tpu.memory_space<vmem>>, vector<1x8x256xf32>
    %42 = vector.shape_cast %41 : vector<1x8x256xf32> to vector<8x256xf32>
    %43 = arith.mulf %40, %42 : vector<8x256xf32>
    %44 = arith.addf %39, %43 : vector<8x256xf32>
    %c0_21 = arith.constant 0 : index
    %c0_22 = arith.constant 0 : index
    %c0_23 = arith.constant 0 : index
    %45 = vector.load %arg3[%c0_21, %c0_22, %c0_23] : memref<1x8x256xf32, #tpu.memory_space<vmem>>, vector<1x8x256xf32>
    %46 = vector.shape_cast %45 : vector<1x8x256xf32> to vector<8x256xf32>
    %47 = vector.shape_cast %44 : vector<8x256xf32> to vector<1x8x256xf32>
    tpu.vector_store %arg3[%c0_21, %c0_22, %c0_23], %47 {strides = array<i32>} : memref<1x8x256xf32, #tpu.memory_space<vmem>>, vector<1x8x256xf32>,
    %cst = arith.constant dense<0.000000e+00> : vector<8xf32>
    %48 = vector.multi_reduction <add>, %44, %cst [1] : vector<8x256xf32> to vector<8xf32>
    %49 = vector.shape_cast %48 : vector<8xf32> to vector<8x1xf32>
    %c0_24 = arith.constant 0 : index
    %c0_25 = arith.constant 0 : index
    %c0_26 = arith.constant 0 : index
    %50 = vector.load %arg4[%c0_24, %c0_25, %c0_26] : memref<1x8x1xf32, #tpu.memory_space<vmem>>, vector<1x8x1xf32>
    %51 = vector.shape_cast %50 : vector<1x8x1xf32> to vector<8x1xf32>
    %52 = vector.shape_cast %49 : vector<8x1xf32> to vector<1x8x1xf32>
    tpu.vector_store %arg4[%c0_24, %c0_25, %c0_26], %52 {strides = array<i32>} : memref<1x8x1xf32, #tpu.memory_space<vmem>>, vector<1x8x1xf32>,
    %53 = arith.mulf %44, %44 : vector<8x256xf32>
    %cst_27 = arith.constant dense<0.000000e+00> : vector<8xf32>
    %54 = vector.multi_reduction <add>, %53, %cst_27 [1] : vector<8x256xf32> to vector<8xf32>
    %55 = vector.shape_cast %54 : vector<8xf32> to vector<8x1xf32>
    %c0_28 = arith.constant 0 : index
    %c0_29 = arith.constant 0 : index
    %c0_30 = arith.constant 0 : index
    %56 = vector.load %arg5[%c0_28, %c0_29, %c0_30] : memref<1x8x1xf32, #tpu.memory_space<vmem>>, vector<1x8x1xf32>
    %57 = vector.shape_cast %56 : vector<1x8x1xf32> to vector<8x1xf32>
    %58 = vector.shape_cast %55 : vector<8x1xf32> to vector<1x8x1xf32>
    tpu.vector_store %arg5[%c0_28, %c0_29, %c0_30], %58 {strides = array<i32>} : memref<1x8x1xf32, #tpu.memory_space<vmem>>, vector<1x8x1xf32>,
    return
  }
  func.func @transform_0(%arg0: i32) -> (i32, i32, i32) {
    %c0_i32 = arith.constant 0 : i32
    %c0_i32_0 = arith.constant 0 : i32
    %c0_i32_1 = arith.constant 0 : i32
    return %arg0, %c0_i32, %c0_i32_0 : i32, i32, i32
  }
  func.func @transform_1(%arg0: i32) -> (i32, i32, i32) {
    %c0_i32 = arith.constant 0 : i32
    %c0_i32_0 = arith.constant 0 : i32
    %c0_i32_1 = arith.constant 0 : i32
    %c0_i32_2 = arith.constant 0 : i32
    return %c0_i32, %c0_i32_0, %c0_i32_1 : i32, i32, i32
  }
  func.func @transform_2(%arg0: i32) -> (i32, i32, i32) {
    %c0_i32 = arith.constant 0 : i32
    %c0_i32_0 = arith.constant 0 : i32
    %c0_i32_1 = arith.constant 0 : i32
    return %arg0, %c0_i32, %c0_i32_0 : i32, i32, i32
  }
  func.func @transform_3(%arg0: i32) -> (i32, i32, i32) {
    %c0_i32 = arith.constant 0 : i32
    %c0_i32_0 = arith.constant 0 : i32
    %c0_i32_1 = arith.constant 0 : i32
    return %arg0, %c0_i32, %c0_i32_0 : i32, i32, i32
  }
  func.func @transform_4(%arg0: i32) -> (i32, i32, i32) {
    %c0_i32 = arith.constant 0 : i32
    %c0_i32_0 = arith.constant 0 : i32
    %c0_i32_1 = arith.constant 0 : i32
    return %arg0, %c0_i32, %c0_i32_0 : i32, i32, i32
  }
}

module attributes {stable_mosaic.version = 11 : i64} {
  func.func @_pw_kernel(%arg0: i32, %arg1: memref<1x8x256xf32, #tpu.memory_space<vmem>>, %arg2: memref<8x1xf32, #tpu.memory_space<vmem>>, %arg3: memref<8x1xf32, #tpu.memory_space<vmem>>, %arg4: memref<16x8xf32, #tpu.memory_space<vmem>>, %arg5: memref<1x16x256xf32, #tpu.memory_space<vmem>>, %arg6: memref<1x16x1xf32, #tpu.memory_space<vmem>>, %arg7: memref<1x16x1xf32, #tpu.memory_space<vmem>>) attributes {dimension_semantics = [#tpu.dimension_semantics<parallel>], iteration_bounds = array<i64: 2>, scalar_prefetch = 0 : i64, scratch_operands = 0 : i64, tpu.core_type = #tpu.core_type<tc>, window_params = [{transform_indices = @transform_0, window_bounds = array<i64: 1, 8, 256>}, {pipeline_mode = #tpu.pipeline_mode<synchronous>, transform_indices = @transform_1, window_bounds = array<i64: 8, 1>}, {pipeline_mode = #tpu.pipeline_mode<synchronous>, transform_indices = @transform_2, window_bounds = array<i64: 8, 1>}, {pipeline_mode = #tpu.pipeline_mode<synchronous>, transform_indices = @transform_3, window_bounds = array<i64: 16, 8>}, {transform_indices = @transform_4, window_bounds = array<i64: 1, 16, 256>}, {transform_indices = @transform_5, window_bounds = array<i64: 1, 16, 1>}, {transform_indices = @transform_6, window_bounds = array<i64: 1, 16, 1>}]} {
    %c0 = arith.constant 0 : index
    %c0_0 = arith.constant 0 : index
    %c0_1 = arith.constant 0 : index
    %0 = vector.load %arg1[%c0, %c0_0, %c0_1] : memref<1x8x256xf32, #tpu.memory_space<vmem>>, vector<1x8x256xf32>
    %1 = vector.shape_cast %0 : vector<1x8x256xf32> to vector<8x256xf32>
    %c0_2 = arith.constant 0 : index
    %c0_3 = arith.constant 0 : index
    %2 = vector.load %arg2[%c0_2, %c0_3] : memref<8x1xf32, #tpu.memory_space<vmem>>, vector<8x1xf32>
    %3 = vector.broadcast %2 : vector<8x1xf32> to vector<8x256xf32>
    %4 = arith.mulf %1, %3 : vector<8x256xf32>
    %c0_4 = arith.constant 0 : index
    %c0_5 = arith.constant 0 : index
    %5 = vector.load %arg3[%c0_4, %c0_5] : memref<8x1xf32, #tpu.memory_space<vmem>>, vector<8x1xf32>
    %6 = vector.broadcast %5 : vector<8x1xf32> to vector<8x256xf32>
    %7 = arith.addf %4, %6 : vector<8x256xf32>
    %8 = arith.negf %7 : vector<8x256xf32>
    %9 = math.exp %8 : vector<8x256xf32>
    %cst = arith.constant 1.000000e+00 : f32
    %10 = vector.broadcast %cst : f32 to vector<8x256xf32>
    %11 = arith.addf %10, %9 : vector<8x256xf32>
    %12 = arith.divf %10, %11 : vector<8x256xf32>
    %13 = arith.mulf %7, %12 : vector<8x256xf32>
    %c0_6 = arith.constant 0 : index
    %c0_7 = arith.constant 0 : index
    %14 = vector.load %arg4[%c0_6, %c0_7] : memref<16x8xf32, #tpu.memory_space<vmem>>, vector<16x8xf32>
    %15 = arith.truncf %14 : vector<16x8xf32> to vector<16x8xbf16>
    %16 = arith.truncf %13 : vector<8x256xf32> to vector<8x256xbf16>
    %cst_8 = arith.constant dense<0.000000e+00> : vector<16x256xf32>
    %17 = tpu.matmul %15, %16, %cst_8 {dimension_numbers = #tpu.dot_dimension_numbers<[1], [0], [0], [1], [0, 0, 1, 1], [], []>} : vector<16x8xbf16>, vector<8x256xbf16>, vector<16x256xf32> -> vector<16x256xf32>
    %c0_9 = arith.constant 0 : index
    %c0_10 = arith.constant 0 : index
    %c0_11 = arith.constant 0 : index
    %18 = vector.load %arg5[%c0_9, %c0_10, %c0_11] : memref<1x16x256xf32, #tpu.memory_space<vmem>>, vector<1x16x256xf32>
    %19 = vector.shape_cast %18 : vector<1x16x256xf32> to vector<16x256xf32>
    %20 = vector.shape_cast %17 : vector<16x256xf32> to vector<1x16x256xf32>
    tpu.vector_store %arg5[%c0_9, %c0_10, %c0_11], %20 {strides = array<i32>} : memref<1x16x256xf32, #tpu.memory_space<vmem>>, vector<1x16x256xf32>,
    %cst_12 = arith.constant dense<0.000000e+00> : vector<16xf32>
    %21 = vector.multi_reduction <add>, %17, %cst_12 [1] : vector<16x256xf32> to vector<16xf32>
    %22 = vector.shape_cast %21 : vector<16xf32> to vector<16x1xf32>
    %c0_13 = arith.constant 0 : index
    %c0_14 = arith.constant 0 : index
    %c0_15 = arith.constant 0 : index
    %23 = vector.load %arg6[%c0_13, %c0_14, %c0_15] : memref<1x16x1xf32, #tpu.memory_space<vmem>>, vector<1x16x1xf32>
    %24 = vector.shape_cast %23 : vector<1x16x1xf32> to vector<16x1xf32>
    %25 = vector.shape_cast %22 : vector<16x1xf32> to vector<1x16x1xf32>
    tpu.vector_store %arg6[%c0_13, %c0_14, %c0_15], %25 {strides = array<i32>} : memref<1x16x1xf32, #tpu.memory_space<vmem>>, vector<1x16x1xf32>,
    %26 = arith.mulf %17, %17 : vector<16x256xf32>
    %cst_16 = arith.constant dense<0.000000e+00> : vector<16xf32>
    %27 = vector.multi_reduction <add>, %26, %cst_16 [1] : vector<16x256xf32> to vector<16xf32>
    %28 = vector.shape_cast %27 : vector<16xf32> to vector<16x1xf32>
    %c0_17 = arith.constant 0 : index
    %c0_18 = arith.constant 0 : index
    %c0_19 = arith.constant 0 : index
    %29 = vector.load %arg7[%c0_17, %c0_18, %c0_19] : memref<1x16x1xf32, #tpu.memory_space<vmem>>, vector<1x16x1xf32>
    %30 = vector.shape_cast %29 : vector<1x16x1xf32> to vector<16x1xf32>
    %31 = vector.shape_cast %28 : vector<16x1xf32> to vector<1x16x1xf32>
    tpu.vector_store %arg7[%c0_17, %c0_18, %c0_19], %31 {strides = array<i32>} : memref<1x16x1xf32, #tpu.memory_space<vmem>>, vector<1x16x1xf32>,
    return
  }
  func.func @transform_0(%arg0: i32) -> (i32, i32, i32) {
    %c0_i32 = arith.constant 0 : i32
    %c0_i32_0 = arith.constant 0 : i32
    %c0_i32_1 = arith.constant 0 : i32
    return %arg0, %c0_i32, %c0_i32_0 : i32, i32, i32
  }
  func.func @transform_1(%arg0: i32) -> (i32, i32) {
    %c0_i32 = arith.constant 0 : i32
    %c0_i32_0 = arith.constant 0 : i32
    %c0_i32_1 = arith.constant 0 : i32
    return %c0_i32, %c0_i32_0 : i32, i32
  }
  func.func @transform_2(%arg0: i32) -> (i32, i32) {
    %c0_i32 = arith.constant 0 : i32
    %c0_i32_0 = arith.constant 0 : i32
    %c0_i32_1 = arith.constant 0 : i32
    return %c0_i32, %c0_i32_0 : i32, i32
  }
  func.func @transform_3(%arg0: i32) -> (i32, i32) {
    %c0_i32 = arith.constant 0 : i32
    %c0_i32_0 = arith.constant 0 : i32
    %c0_i32_1 = arith.constant 0 : i32
    return %c0_i32, %c0_i32_0 : i32, i32
  }
  func.func @transform_4(%arg0: i32) -> (i32, i32, i32) {
    %c0_i32 = arith.constant 0 : i32
    %c0_i32_0 = arith.constant 0 : i32
    %c0_i32_1 = arith.constant 0 : i32
    return %arg0, %c0_i32, %c0_i32_0 : i32, i32, i32
  }
  func.func @transform_5(%arg0: i32) -> (i32, i32, i32) {
    %c0_i32 = arith.constant 0 : i32
    %c0_i32_0 = arith.constant 0 : i32
    %c0_i32_1 = arith.constant 0 : i32
    return %arg0, %c0_i32, %c0_i32_0 : i32, i32, i32
  }
  func.func @transform_6(%arg0: i32) -> (i32, i32, i32) {
    %c0_i32 = arith.constant 0 : i32
    %c0_i32_0 = arith.constant 0 : i32
    %c0_i32_1 = arith.constant 0 : i32
    return %arg0, %c0_i32, %c0_i32_0 : i32, i32, i32
  }
}

module attributes {stable_mosaic.version = 11 : i64} {
  func.func @_bn_act_kernel(%arg0: i32, %arg1: memref<1x16x256xf32, #tpu.memory_space<vmem>>, %arg2: memref<16x1xf32, #tpu.memory_space<vmem>>, %arg3: memref<16x1xf32, #tpu.memory_space<vmem>>, %arg4: memref<1x16x256xf32, #tpu.memory_space<vmem>>) attributes {dimension_semantics = [#tpu.dimension_semantics<parallel>], iteration_bounds = array<i64: 2>, scalar_prefetch = 0 : i64, scratch_operands = 0 : i64, tpu.core_type = #tpu.core_type<tc>, window_params = [{transform_indices = @transform_0, window_bounds = array<i64: 1, 16, 256>}, {pipeline_mode = #tpu.pipeline_mode<synchronous>, transform_indices = @transform_1, window_bounds = array<i64: 16, 1>}, {pipeline_mode = #tpu.pipeline_mode<synchronous>, transform_indices = @transform_2, window_bounds = array<i64: 16, 1>}, {transform_indices = @transform_3, window_bounds = array<i64: 1, 16, 256>}]} {
    %c0 = arith.constant 0 : index
    %c0_0 = arith.constant 0 : index
    %c0_1 = arith.constant 0 : index
    %0 = vector.load %arg1[%c0, %c0_0, %c0_1] : memref<1x16x256xf32, #tpu.memory_space<vmem>>, vector<1x16x256xf32>
    %1 = vector.shape_cast %0 : vector<1x16x256xf32> to vector<16x256xf32>
    %c0_2 = arith.constant 0 : index
    %c0_3 = arith.constant 0 : index
    %2 = vector.load %arg2[%c0_2, %c0_3] : memref<16x1xf32, #tpu.memory_space<vmem>>, vector<16x1xf32>
    %3 = vector.broadcast %2 : vector<16x1xf32> to vector<16x256xf32>
    %4 = arith.mulf %1, %3 : vector<16x256xf32>
    %c0_4 = arith.constant 0 : index
    %c0_5 = arith.constant 0 : index
    %5 = vector.load %arg3[%c0_4, %c0_5] : memref<16x1xf32, #tpu.memory_space<vmem>>, vector<16x1xf32>
    %6 = vector.broadcast %5 : vector<16x1xf32> to vector<16x256xf32>
    %7 = arith.addf %4, %6 : vector<16x256xf32>
    %8 = arith.negf %7 : vector<16x256xf32>
    %9 = math.exp %8 : vector<16x256xf32>
    %cst = arith.constant 1.000000e+00 : f32
    %10 = vector.broadcast %cst : f32 to vector<16x256xf32>
    %11 = arith.addf %10, %9 : vector<16x256xf32>
    %12 = arith.divf %10, %11 : vector<16x256xf32>
    %13 = arith.mulf %7, %12 : vector<16x256xf32>
    %c0_6 = arith.constant 0 : index
    %c0_7 = arith.constant 0 : index
    %c0_8 = arith.constant 0 : index
    %14 = vector.load %arg4[%c0_6, %c0_7, %c0_8] : memref<1x16x256xf32, #tpu.memory_space<vmem>>, vector<1x16x256xf32>
    %15 = vector.shape_cast %14 : vector<1x16x256xf32> to vector<16x256xf32>
    %16 = vector.shape_cast %13 : vector<16x256xf32> to vector<1x16x256xf32>
    tpu.vector_store %arg4[%c0_6, %c0_7, %c0_8], %16 {strides = array<i32>} : memref<1x16x256xf32, #tpu.memory_space<vmem>>, vector<1x16x256xf32>,
    return
  }
  func.func @transform_0(%arg0: i32) -> (i32, i32, i32) {
    %c0_i32 = arith.constant 0 : i32
    %c0_i32_0 = arith.constant 0 : i32
    %c0_i32_1 = arith.constant 0 : i32
    return %arg0, %c0_i32, %c0_i32_0 : i32, i32, i32
  }
  func.func @transform_1(%arg0: i32) -> (i32, i32) {
    %c0_i32 = arith.constant 0 : i32
    %c0_i32_0 = arith.constant 0 : i32
    %c0_i32_1 = arith.constant 0 : i32
    return %c0_i32, %c0_i32_0 : i32, i32
  }
  func.func @transform_2(%arg0: i32) -> (i32, i32) {
    %c0_i32 = arith.constant 0 : i32
    %c0_i32_0 = arith.constant 0 : i32
    %c0_i32_1 = arith.constant 0 : i32
    return %c0_i32, %c0_i32_0 : i32, i32
  }
  func.func @transform_3(%arg0: i32) -> (i32, i32, i32) {
    %c0_i32 = arith.constant 0 : i32
    %c0_i32_0 = arith.constant 0 : i32
    %c0_i32_1 = arith.constant 0 : i32
    return %arg0, %c0_i32, %c0_i32_0 : i32, i32, i32
  }
}

</mosaic_0001>

<bundles_post_ra>
// kernel: depthwise_conv_forward.5
= control target key start
LH: loop header
LB: loop body
LE: loop exit
PB: predicated region body
PF: predicated region fallthrough
CT: control target
= control target key end

     0   :  { %s367_s12 = smov 0   ;;  %s403_s0 = inlined_call_operand.vmem [shape: f32[2,16,256], index: 0, kind: input, shape index: {}]   ;;  %s404_s1 = inlined_call_operand.vmem [shape: f32[16,1], index: 1, kind: input, shape index: {}]   ;;  %s405_s2 = inlined_call_operand.vmem [shape: f32[16,1], index: 2, kind: input, shape index: {}]   ;;  %s406_s3 = inlined_call_operand.vmem [shape: f32[2,16,256], index: 3, kind: output, shape index: {}]  }
   0x1 LB: > { %s294_s13 = sadd.s32 4294967295, %s344_s12   ;;  %p298_p0 = scmp.ge.s32.totalorder %s344_s12, 1  ;;  %s344_s12 = sphi %s367_s12, %s13_s12  }
   0x2   : > { %p137_p1 = scmp.lt.s32.totalorder %s344_s12, 3 }
   0x4   : > { %p138_p2 = pnand %p298_p0, %p137_p1 }
   0x5   : > { %v191_v0 = vld [vmem:[%s405_s2] sm:$0xff] (!%p138_p2)  ;;  %v346_v2 = vmov (!%p138_p2), 0   ;;  %v192_v3 = vld [vmem:[%s405_s2 + $0x8] sm:$0xff] (!%p138_p2)  ;;  %p161_p3 = scmp.lt.s32.totalorder (!%p138_p2), %s294_s13, 1 }
   0x6   : > { %141 = sbr.rel (%p138_p2) target bundleno = 173 (0xad), region = 32  ;;  %v175_v1 = vld [vmem:[%s404_s1] sm:$0xff] (!%p138_p2)  ;;  %321 = vset.pattern.permute.xlu1 (!%p138_p2), %v346_v2  ;;  %320 = vset.pattern.permute.xlu0 (!%p138_p2), %v346_v2  ;;  %v176_v4 = vld [vmem:[%s404_s1 + $0x8] sm:$0xff] (!%p138_p2) }
   0x7   : > { %195 = vperm.xlu1 (!%p138_p2), %321, %v191_v0   ;;  %179 = vperm.xlu0 (!%p138_p2), %320, %v175_v1  }
   0xb   : > { %200 = vperm.xlu1 (!%p138_p2), %321, %v192_v3   ;;  %184 = vperm.xlu0 (!%p138_p2), %320, %v176_v4  }
   0xd   : > { %s408_s13 = smov (!%p161_p3, %s294_s13), 1 }
   0xe   : > { %s309_s22 = sshll.u32 %s408_s13, 5 }
   0xf   : > { %s165_s25 = scalar_lea.vmem %s403_s0, %s309_s22  ;;  %s170_s28 = scalar_lea.vmem %s406_s3, %s309_s22 }
  0x10   : > { %v171_v5 = vld [vmem:[%s165_s25] sm:$0xff]  ;;  %v172_v6 = vld [vmem:[%s165_s25 + $0x8] sm:$0xff]  ;;  %v173_v11 = vld [vmem:[%s165_s25 + $0x10] sm:$0xff] }
  0x11   : > { %v174_v12 = vld [vmem:[%s165_s25 + $0x18] sm:$0xff] }
  0x86   : > { %v196_v7 = vpop.permute.xlu1 %195  ;;  %v180_v8 = vpop.permute.xlu0 %179 }
  0x87   : > { %v187_v9 = vmul.f32 %v180_v8, %v171_v5  ;;  %v188_v10 = vmul.f32 %v180_v8, %v172_v6 }
  0x89   : > { %v203_v13 = vadd.f32 %v196_v7, %v187_v9  ;;  %v204_v14 = vadd.f32 %v196_v7, %v188_v10 }
  0x8a   : > { %v185_v15 = vpop.permute.xlu0 %184  ;;  %v201_v20 = vpop.permute.xlu1 %200 }
  0x8b   : > { %v303_v16 = vmul.f32 -1.442695, %v203_v13  ;;  %v304_v17 = vmul.f32 -1.442695, %v204_v14  ;;  %v189_v18 = vmul.f32 %v185_v15, %v173_v11  ;;  %v190_v19 = vmul.f32 %v185_v15, %v174_v12 }
  0x8d   : > { %322 = vpow2.f32 %v303_v16  ;;  %v205_v21 = vadd.f32 %v201_v20, %v189_v18  ;;  %v206_v22 = vadd.f32 %v201_v20, %v190_v19 }
  0x8e   : > { %324 = vpow2.f32 %v304_v17 }
  0x8f   : > { %v305_v23 = vmul.f32 -1.442695, %v205_v21  ;;  %v306_v24 = vmul.f32 -1.442695, %v206_v22 }
  0x91   : > { %326 = vpow2.f32 %v305_v23 }
  0x92   : > { %328 = vpow2.f32 %v306_v24 }
  0x97   : > { %v323_v25 = vpop.eup %322 }
  0x98   : > { %v325_v26 = vpop.eup %324  ;;  %v219_v27 = vadd.f32 1.0, %v323_v25 }
  0x99   : > { %v220_v28 = vadd.f32 1.0, %v325_v26 }
  0x9a   : > { %330 = vrcp.f32 %v219_v27 }
  0x9b   : > { %v327_v29 = vpop.eup %326  ;;  %332 = vrcp.f32 %v220_v28 }
  0x9c   : > { %v329_v30 = vpop.eup %328  ;;  %v221_v31 = vadd.f32 1.0, %v327_v29 }
  0x9d   : > { %v222_v32 = vadd.f32 1.0, %v329_v30 }
  0x9e   : > { %334 = vrcp.f32 %v221_v31 }
  0x9f   : > { %336 = vrcp.f32 %v222_v32 }
  0xa4   : > { %v331_v33 = vpop.eup %330 }
  0xa5   : > { %v333_v34 = vpop.eup %332  ;;  %v231_v35 = vmul.f32 %v331_v33, %v203_v13 }
  0xa6   : > { %v232_v36 = vmul.f32 %v333_v34, %v204_v14 }
  0xa7   : > { %235 = vst [vmem:[%s170_s28] sm:$0xff] %v231_v35 }
  0xa8   : > { %v335_v37 = vpop.eup %334  ;;  %236 = vst [vmem:[%s170_s28 + $0x8] sm:$0xff] %v232_v36 }
  0xa9   : > { %v337_v38 = vpop.eup %336  ;;  %v233_v39 = vmul.f32 %v335_v37, %v205_v21 }
  0xaa   : > { %v234_v40 = vmul.f32 %v337_v38, %v206_v22 }
  0xab   : > { %237 = vst [vmem:[%s170_s28 + $0x10] sm:$0xff] %v233_v39 }
  0xac   : > { %238 = vst [vmem:[%s170_s28 + $0x18] sm:$0xff] %v234_v40 }
  0xad PF: > { %s13_s12 = sadd.s32 1, %s344_s12  }
  0xae   : > { %p10_p4 = scmp.ge.s32.totalorder %s13_s12, 4  }
  0xb0   :  { %12 = sbr.rel (!%p10_p4) target bundleno = 1 (0x1), region = 62 }

// kernel: depthwise_conv_forward.3
= control target key start
LH: loop header
LB: loop body
LE: loop exit
PB: predicated region body
PF: predicated region fallthrough
CT: control target
= control target key end

     0   :  { %s557_s15 = smov 0   ;;  %s656_s0 = inlined_call_operand.vmem [shape: f32[2,8,256], index: 0, kind: input, shape index: {}]   ;;  %s657_s1 = inlined_call_operand.vmem [shape: f32[9,8,256], index: 1, kind: input, shape index: {}]   ;;  %s658_s2 = inlined_call_operand.vmem [shape: f32[2,8,256], index: 2, kind: output, shape index: {0}]   ;;  %s659_s3 = inlined_call_operand.vmem [shape: f32[2,8,1], index: 3, kind: output, shape index: {1}]   ;;  %s660_s4 = inlined_call_operand.vmem [shape: f32[2,8,1], index: 4, kind: output, shape index: {2}]  }
   0x1 LB: > { %s469_s16 = sadd.s32 4294967295, %s522_s15   ;;  %p473_p0 = scmp.ge.s32.totalorder %s522_s15, 1  ;;  %s522_s15 = sphi %s557_s15, %s15_s15  }
   0x2   : > { %p167_p1 = scmp.lt.s32.totalorder %s522_s15, 3 }
   0x4   : > { %p168_p2 = pnand %p473_p0, %p167_p1 }
   0x5   : > { %p201_p3 = scmp.lt.s32.totalorder (!%p168_p2), %s469_s16, 1  ;;  %s524_s21 = smov (!%p168_p2), 16   ;;  %v230_v2 = vlaneseq (!%p168_p2)  ;;  %v480_v8 = vld [vmem:[%s657_s1 + $0x40] sm:$0xff] (!%p168_p2)  ;;  %v481_v9 = vld [vmem:[%s657_s1 + $0x48] sm:$0xff] (!%p168_p2)  ;;  %v482_v22 = vld [vmem:[%s657_s1 + $0x10] sm:$0xff] (!%p168_p2)  ;;  %vm344_vm8 = vcmask (!%p168_p2), 7168  }
   0x6   : > { %171 = sbr.rel (%p168_p2) target bundleno = 312 (0x138), region = 28  ;;  %s525_s22 = smov (!%p168_p2), 17   ;;  %v235_v10 = vld [vmem:[%s657_s1] sm:$0xff] (!%p168_p2)  ;;  %v236_v11 = vld [vmem:[%s657_s1 + $0x8] sm:$0xff] (!%p168_p2)  ;;  %v483_v23 = vld [vmem:[%s657_s1 + $0x18] sm:$0xff] (!%p168_p2) }
   0x7   : > { %s526_s23 = smov (!%p168_p2), 15   ;;  %s527_s24 = smov (!%p168_p2), 1   ;;  %v573_v5 = vand.u32 (!%p168_p2), 127, %v230_v2  ;;  %v484_v28 = vld [vmem:[%s657_s1 + $0x20] sm:$0xff] (!%p168_p2)  ;;  %v485_v29 = vld [vmem:[%s657_s1 + $0x28] sm:$0xff] (!%p168_p2)  ;;  %v486_v36 = vld [vmem:[%s657_s1 + $0x30] sm:$0xff] (!%p168_p2) }
   0x8   : > { %s528_s25 = smov (!%p168_p2), 127   ;;  %s529_s26 = smov (!%p168_p2), 113   ;;  %v487_v37 = vld [vmem:[%s657_s1 + $0x38] sm:$0xff] (!%p168_p2)  ;;  %v488_v44 = vld [vmem:[%s657_s1 + $0x50] sm:$0xff] (!%p168_p2)  ;;  %v490_v52 = vld [vmem:[%s657_s1 + $0x60] sm:$0xff] (!%p168_p2) }
   0x9   : > { %s530_s27 = smov (!%p168_p2), 112   ;;  %s531_s28 = smov (!%p168_p2), 111   ;;  %vm232_vm0 = vcmp.lt.s32.totalorder (!%p168_p2), %v573_v5, 17  ;;  %vm245_vm1 = vcmp.lt.s32.totalorder (!%p168_p2), %v573_v5, 16  ;;  %vm259_vm2 = vcmp.lt.s32.totalorder (!%p168_p2), %v573_v5, 15  ;;  %vm273_vm3 = vcmp.lt.s32.totalorder (!%p168_p2), %v573_v5, 1 }
   0xa   : > { %vm287_vm4 = vcmp.lt.s32.totalorder (!%p168_p2), %v573_v5, 127  ;;  %vm301_vm5 = vcmp.lt.s32.totalorder (!%p168_p2), %v573_v5, 113  ;;  %v489_v45 = vld [vmem:[%s657_s1 + $0x58] sm:$0xff] (!%p168_p2)  ;;  %v491_v53 = vld [vmem:[%s657_s1 + $0x68] sm:$0xff] (!%p168_p2)  ;;  %vm315_vm6 = vcmp.lt.s32.totalorder (!%p168_p2), %v573_v5, 112  ;;  %v492_v60 = vld [vmem:[%s657_s1 + $0x70] sm:$0xff] (!%p168_p2) }
   0xb   : > { %v493_v61 = vld [vmem:[%s657_s1 + $0x78] sm:$0xff] (!%p168_p2)  ;;  %vm329_vm7 = vcmp.lt.s32.totalorder (!%p168_p2), %v573_v5, 111 }
   0xd   : > { %s662_s16 = smov (!%p201_p3, %s469_s16), 1 }
   0xe   : > { %s498_s17 = sshll.u32 %s662_s16, 4 }
   0xf   : > { %s205_s20 = scalar_lea.vmem %s656_s0, %s498_s17 }
  0x10   : > { %v219_v0 = vld [vmem:[%s205_s20] sm:$0xff]  ;;  %v220_v1 = vld [vmem:[%s205_s20 + $0x8] sm:$0xff] }
  0x11   : > { %241 = vrot.lane.b32.xlu1 %v219_v0, %s524_s21  ;;  %226 = vrot.lane.b32.xlu0 %v219_v0, %s525_s22  ;;  %v225_v16 = vmul.f32 %v481_v9, %v220_v1  ;;  %v224_v17 = vmul.f32 %v480_v8, %v219_v0 }
  0x15   : > { %243 = vrot.lane.b32.xlu1 %v220_v1, %s524_s21  ;;  %228 = vrot.lane.b32.xlu0 %v220_v1, %s525_s22  ;;  %s210_s21 = scalar_lea.vmem %s658_s2, %s498_s17  ;;  %s478_s22 = sshll.u32 %s662_s16, 3 }
  0x16   : > { %s218_s17 = scalar_lea.vmem %s660_s4, %s478_s22 }
  0x19   : > { %257 = vrot.lane.b32.xlu1 %v220_v1, %s526_s23  ;;  %255 = vrot.lane.b32.xlu0 %v219_v0, %s526_s23 }
  0x1d   : > { %271 = vrot.lane.b32.xlu1 %v220_v1, %s527_s24  ;;  %269 = vrot.lane.b32.xlu0 %v219_v0, %s527_s24 }
  0x21   : > { %285 = vrot.lane.b32.xlu1 %v220_v1, %s528_s25  ;;  %283 = vrot.lane.b32.xlu0 %v219_v0, %s528_s25  ;;  %s214_s25 = scalar_lea.vmem %s659_s3, %s478_s22 }
  0x25   : > { %299 = vrot.lane.b32.xlu1 %v220_v1, %s529_s26  ;;  %297 = vrot.lane.b32.xlu0 %v219_v0, %s529_s26 }
  0x29   : > { %313 = vrot.lane.b32.xlu1 %v220_v1, %s530_s27  ;;  %311 = vrot.lane.b32.xlu0 %v219_v0, %s530_s27 }
  0x2d   : > { %327 = vrot.lane.b32.xlu1 %v220_v1, %s531_s28  ;;  %325 = vrot.lane.b32.xlu0 %v219_v0, %s531_s28 }
  0x83   : > { %v242_v3 = vpop.permute.xlu1 %241  ;;  %v227_v4 = vpop.permute.xlu0 %226 }
  0x87   : > { %v244_v6 = vpop.permute.xlu1 %243  ;;  %v229_v7 = vpop.permute.xlu0 %228 }
  0x88   : > { %v233_v12 = vsel %vm232_vm0, %v227_v4, %v229_v7  ;;  %v234_v13 = vsel %vm232_vm0, %v229_v7, %v227_v4  ;;  %v246_v24 = vsel %vm245_vm1, %v242_v3, %v244_v6  ;;  %v247_v25 = vsel %vm245_vm1, %v244_v6, %v242_v3 }
  0x89   : > { %v237_v18 = vmul.f32 %v235_v10, %v234_v13  ;;  %v238_v19 = vmul.f32 %v236_v11, %v233_v12  ;;  %v251_v32 = vmul.f32 %v482_v22, %v247_v25  ;;  %v252_v33 = vmul.f32 %v483_v23, %v246_v24  ;;  %v494_v11 = vld [vmem:[%s657_s1 + $0x80] sm:$0xff]  ;;  %v495_v12 = vld [vmem:[%s657_s1 + $0x88] sm:$0xff] }
  0x8b   : > { %v258_v14 = vpop.permute.xlu1 %257  ;;  %v256_v15 = vpop.permute.xlu0 %255  ;;  %v239_v26 = vadd.f32 %v237_v18, %v224_v17  ;;  %v240_v27 = vadd.f32 %v238_v19, %v225_v16 }
  0x8c   : > { %v260_v30 = vsel %vm259_vm2, %v256_v15, %v258_v14  ;;  %v261_v31 = vsel %vm259_vm2, %v258_v14, %v256_v15 }
  0x8d   : > { %v254_v40 = vadd.f32 %v252_v33, %v240_v27  ;;  %v253_v41 = vadd.f32 %v251_v32, %v239_v26  ;;  %v265_v42 = vmul.f32 %v484_v28, %v261_v31  ;;  %v266_v43 = vmul.f32 %v485_v29, %v260_v30 }
  0x8f   : > { %v272_v20 = vpop.permute.xlu1 %271  ;;  %v270_v21 = vpop.permute.xlu0 %269  ;;  %v267_v56 = vadd.f32 %v265_v42, %v253_v41  ;;  %v268_v57 = vadd.f32 %v266_v43, %v254_v40 }
  0x90   : > { %v274_v38 = vsel %vm273_vm3, %v270_v21, %v272_v20  ;;  %v275_v39 = vsel %vm273_vm3, %v272_v20, %v270_v21 }
  0x91   : > { %v279_v48 = vmul.f32 %v486_v36, %v275_v39  ;;  %v280_v49 = vmul.f32 %v487_v37, %v274_v38 }
  0x93   : > { %v286_v34 = vpop.permute.xlu1 %285  ;;  %v284_v35 = vpop.permute.xlu0 %283  ;;  %v281_v62 = vadd.f32 %v279_v48, %v267_v56  ;;  %v282_v63 = vadd.f32 %v280_v49, %v268_v57 }
  0x94   : > { %v288_v46 = vsel %vm287_vm4, %v284_v35, %v286_v34  ;;  %v289_v47 = vsel %vm287_vm4, %v286_v34, %v284_v35 }
  0x95   : > { %v293_v58 = vmul.f32 %v488_v44, %v288_v46  ;;  %v294_v59 = vmul.f32 %v489_v45, %v289_v47 }
  0x97   : > { %v300_v50 = vpop.permute.xlu1 %299  ;;  %v298_v51 = vpop.permute.xlu0 %297  ;;  %v295_v7 = vadd.f32 %v293_v58, %v281_v62  ;;  %v296_v8 = vadd.f32 %v294_v59, %v282_v63 }
  0x98   : > { %v302_v54 = vsel %vm301_vm5, %v298_v51, %v300_v50  ;;  %v303_v55 = vsel %vm301_vm5, %v300_v50, %v298_v51 }
  0x99   : > { %v307_v0 = vmul.f32 %v490_v52, %v302_v54  ;;  %v308_v1 = vmul.f32 %v491_v53, %v303_v55 }
  0x9b   : > { %v314_v2 = vpop.permute.xlu1 %313  ;;  %v312_v3 = vpop.permute.xlu0 %311  ;;  %v309_v13 = vadd.f32 %v307_v0, %v295_v7  ;;  %v310_v14 = vadd.f32 %v308_v1, %v296_v8 }
  0x9c   : > { %v316_v4 = vsel %vm315_vm6, %v312_v3, %v314_v2  ;;  %v317_v6 = vsel %vm315_vm6, %v314_v2, %v312_v3 }
  0x9d   : > { %v321_v9 = vmul.f32 %v492_v60, %v316_v4  ;;  %v322_v10 = vmul.f32 %v493_v61, %v317_v6 }
  0x9f   : > { %v328_v15 = vpop.permute.xlu1 %327  ;;  %v326_v16 = vpop.permute.xlu0 %325  ;;  %v323_v5 = vadd.f32 %v321_v9, %v309_v13  ;;  %v324_v19 = vadd.f32 %v322_v10, %v310_v14 }
  0xa0   : > { %v330_v17 = vsel %vm329_vm7, %v326_v16, %v328_v15  ;;  %v331_v18 = vsel %vm329_vm7, %v328_v15, %v326_v16 }
  0xa1   : > { %v335_v20 = vmul.f32 %v494_v11, %v330_v17  ;;  %v336_v21 = vmul.f32 %v495_v12, %v331_v18 }
  0xa3   : > { %v337_v22 = vadd.f32 %v335_v20, %v323_v5  ;;  %v338_v23 = vadd.f32 %v336_v21, %v324_v19 }
  0xa5   : > { %339 = vst [vmem:[%s210_s21] sm:$0xff] %v337_v22  ;;  %340 = vst [vmem:[%s210_s21 + $0x8] sm:$0xff] %v338_v23  ;;  %v341_v24 = vadd.f32 %v338_v23, %v337_v22  ;;  %v346_v25 = vmul.f32 %v337_v22, %v337_v22  ;;  %v347_v26 = vmul.f32 %v338_v23, %v338_v23 }
  0xa7   : > { %342 = vadd.xlane.f32.xlu0 %v341_v24  ;;  %v348_v27 = vadd.f32 %v347_v26, %v346_v25 }
  0xa9   : > { %349 = vadd.xlane.f32.xlu1 %v348_v27 }
 0x134   : > { %v343_v28 = vpop.xlane.xlu0 %342 }
 0x135   : > { %345 = vst.msk [vmem:[%s214_s25] sm:$0xff] %vm344_vm8, %v343_v28 }
 0x136   : > { %v350_v29 = vpop.xlane.xlu1 %349 }
 0x137   : > { %351 = vst.msk [vmem:[%s218_s17] sm:$0xff] %vm344_vm8, %v350_v29 }
 0x138 PF: > { %s15_s15 = sadd.s32 1, %s522_s15  }
 0x139   : > { %p12_p4 = scmp.ge.s32.totalorder %s15_s15, 4  }
 0x13b   :  { %14 = sbr.rel (!%p12_p4) target bundleno = 1 (0x1), region = 90 }

// kernel: depthwise_conv_forward.4
= control target key start
LH: loop header
LB: loop body
LE: loop exit
PB: predicated region body
PF: predicated region fallthrough
CT: control target
= control target key end

     0   :  { %s600_s21 = smov 0   ;;  %s644_s0 = inlined_call_operand.vmem [shape: f32[2,8,256], index: 0, kind: input, shape index: {}]   ;;  %s645_s1 = inlined_call_operand.vmem [shape: f32[8,1], index: 1, kind: input, shape index: {}]   ;;  %s646_s2 = inlined_call_operand.vmem [shape: f32[8,1], index: 2, kind: input, shape index: {}]   ;;  %s647_s3 = inlined_call_operand.vmem [shape: f32[16,8], index: 3, kind: input, shape index: {}]   ;;  %s648_s4 = inlined_call_operand.vmem [shape: f32[2,16,256], index: 4, kind: output, shape index: {0}]   ;;  %s649_s5 = inlined_call_operand.vmem [shape: f32[2,16,1], index: 5, kind: output, shape index: {1}]   ;;  %s650_s6 = inlined_call_operand.vmem [shape: f32[2,16,1], index: 6, kind: output, shape index: {2}]  }
   0x1 LB: > { %s515_s22 = sadd.s32 4294967295, %s562_s21   ;;  %p519_p0 = scmp.ge.s32.totalorder %s562_s21, 1  ;;  %s562_s21 = sphi %s600_s21, %s17_s21  }
   0x2   : > { %p217_p1 = scmp.lt.s32.totalorder %s562_s21, 3 }
   0x4   : > { %p218_p2 = pnand %p519_p0, %p217_p1 }
   0x5   : > { %v280_v0 = vld [vmem:[%s645_s1] sm:$0xff] (!%p218_p2)  ;;  %v564_v1 = vmov (!%p218_p2), 0   ;;  %p257_p3 = scmp.lt.s32.totalorder (!%p218_p2), %s515_s22, 1  ;;  %vm319_vm0 = vcmask (!%p218_p2), 1043456   ;;  %v311_v23 = vld [vmem:[%s647_s3 + $0x8] sm:$0xff] (!%p218_p2)  ;;  %vm315_vm1 = vcmask (!%p218_p2), 64512  }
   0x6   : > { %221 = sbr.rel (%p218_p2) target bundleno = 542 (0x21e), region = 36  ;;  %547 = vset.pattern.permute.xlu0 (!%p218_p2), %v564_v1  ;;  %358 = vmatprep.mubr.bf16.mxu0 (!%p218_p2), %v564_v1  ;;  %v288_v2 = vld [vmem:[%s646_s2] sm:$0xff] (!%p218_p2)  ;;  %vm379_vm2 = vcmask (!%p218_p2), 7168  }
   0x7   : > { %283 = vperm.xlu0 (!%p218_p2), %547, %v280_v0   ;;  %v310_v22 = vld [vmem:[%s647_s3] sm:$0xff] (!%p218_p2) }
   0x8   : > { %v312_v26 = vpack.c.bf16 (!%p218_p2), %v311_v23, %v310_v22 }
   0xb   : > { %291 = vperm.xlu0 (!%p218_p2), %547, %v288_v2  }
   0xd   : > { %s652_s22 = smov (!%p257_p3, %s515_s22), 1 }
   0xe   : > { %s617_s27 = sshll.u32 %s652_s22, 4  ;;  %s535_s11 = sshll.u32 %s652_s22, 5 }
   0xf   : > { %s261_s30 = scalar_lea.vmem %s644_s0, %s617_s27  ;;  %s266_s14 = scalar_lea.vmem %s648_s4, %s535_s11 }
  0x10   : > { %v278_v4 = vld [vmem:[%s261_s30] sm:$0xff]  ;;  %v279_v5 = vld [vmem:[%s261_s30 + $0x8] sm:$0xff]  ;;  %s271_s17 = scalar_lea.vmem %s649_s5, %s617_s27  ;;  %s276_s20 = scalar_lea.vmem %s650_s6, %s617_s27 }
  0x86   : > { %v284_v3 = vpop.permute.xlu0 %283 }
  0x87   : > { %v286_v6 = vmul.f32 %v284_v3, %v278_v4  ;;  %v287_v7 = vmul.f32 %v284_v3, %v279_v5 }
  0x8a   : > { %v292_v8 = vpop.permute.xlu0 %291 }
  0x8b   : > { %v294_v9 = vadd.f32 %v292_v8, %v286_v6  ;;  %v295_v10 = vadd.f32 %v292_v8, %v287_v7 }
  0x8d   : > { %v528_v11 = vmul.f32 -1.442695, %v294_v9  ;;  %v529_v12 = vmul.f32 -1.442695, %v295_v10 }
  0x8f   : > { %548 = vpow2.f32 %v528_v11 }
  0x90   : > { %550 = vpow2.f32 %v529_v12 }
  0x99   : > { %v549_v13 = vpop.eup %548 }
  0x9a   : > { %v551_v14 = vpop.eup %550  ;;  %v302_v15 = vadd.f32 1.0, %v549_v13 }
  0x9b   : > { %v303_v16 = vadd.f32 1.0, %v551_v14 }
  0x9c   : > { %552 = vrcp.f32 %v302_v15 }
  0x9d   : > { %554 = vrcp.f32 %v303_v16 }
  0xa6   : > { %v553_v17 = vpop.eup %552 }
  0xa7   : > { %v555_v18 = vpop.eup %554  ;;  %v308_v19 = vmul.f32 %v553_v17, %v294_v9 }
  0xa8   : > { %v309_v20 = vmul.f32 %v555_v18, %v295_v10 }
  0xa9   : > { %v313_v21 = vpack.c.bf16 %v308_v19, %v308_v19 }
  0xaa   : > { %v314_v24 = vpack.c.bf16 %v309_v20, %v309_v20 }
  0xab   : > { %v321_v25 = vsel %vm319_vm0, %v313_v21, 0 }
  0xac   : > { %530 = vmatprep.subr.msk.bf16.mxu0 %vm319_vm0, %v314_v24 }
  0xad   : > { %327 = vmatpush1.bf16.msra.mxu0 %v321_v25 }
  0xb0   : > { %531 = vmatmul.mubr.msk.bf16.vlgmr.msra.gmra.mrb[0].mxu0 %vm315_vm1, %v312_v26 }
 0x183   : > { %v360_v27 = vpop.f32.mrb[0].mxu0 }
 0x184   : > { %369 = vst [vmem:[%s266_s14] sm:$0xff] %v360_v27  ;;  %v362_v28 = vpop.f32.mrb[1].mxu0  ;;  %v382_v29 = vmul.f32 %v360_v27, %v360_v27 }
 0x185   : > { %370 = vst [vmem:[%s266_s14 + $0x8] sm:$0xff] %v362_v28  ;;  %v364_v30 = vpop.f32.mrb[2].mxu0  ;;  %v373_v31 = vadd.f32 %v362_v28, %v360_v27  ;;  %v383_v32 = vmul.f32 %v362_v28, %v362_v28 }
 0x186   : > { %371 = vst [vmem:[%s266_s14 + $0x10] sm:$0xff] %v364_v30  ;;  %v366_v33 = vpop.f32.mrb[3].mxu0  ;;  %v384_v34 = vmul.f32 %v364_v30, %v364_v30 }
 0x187   : > { %372 = vst [vmem:[%s266_s14 + $0x18] sm:$0xff] %v366_v33  ;;  %v385_v35 = vmul.f32 %v366_v33, %v366_v33  ;;  %374 = vadd.xlane.f32.xlu1 %v373_v31  ;;  %v386_v36 = vadd.f32 %v383_v32, %v382_v29  ;;  %v376_v37 = vadd.f32 %v366_v33, %v364_v30 }
 0x189   : > { %387 = vadd.xlane.f32.xlu0 %v386_v36  ;;  %v389_v38 = vadd.f32 %v385_v35, %v384_v34 }
 0x18b   : > { %377 = vadd.xlane.f32.xlu1 %v376_v37 }
 0x18f   : > { %390 = vadd.xlane.f32.xlu1 %v389_v38 }
 0x214   : > { %v375_v39 = vpop.xlane.xlu1 %374 }
 0x215   : > { %380 = vst.msk [vmem:[%s271_s17] sm:$0xff] %vm379_vm2, %v375_v39 }
 0x216   : > { %v388_v40 = vpop.xlane.xlu0 %387 }
 0x217   : > { %392 = vst.msk [vmem:[%s276_s20] sm:$0xff] %vm379_vm2, %v388_v40 }
 0x218   : > { %v378_v41 = vpop.xlane.xlu1 %377 }
 0x219   : > { %381 = vst.msk [vmem:[%s271_s17 + $0x8] sm:$0xff] %vm379_vm2, %v378_v41 }
 0x21c   : > { %v391_v42 = vpop.xlane.xlu1 %390 }
 0x21d   : > { %393 = vst.msk [vmem:[%s276_s20 + $0x8] sm:$0xff] %vm379_vm2, %v391_v42 }
 0x21e PF: > { %s17_s21 = sadd.s32 1, %s562_s21  }
 0x21f   : > { %p14_p4 = scmp.ge.s32.totalorder %s17_s21, 4  }
 0x221   :  { %16 = sbr.rel (!%p14_p4) target bundleno = 1 (0x1), region = 90 }

</bundles_post_ra>
